<compile_context>
chip_gen: v7x
topology: tpu7x:2x2x1
jax: 0.10.0
libtpu: 0.0.40
codegen_flags: <defaults>
</compile_context>

<pallas_src>
import functools

import jax
import jax.numpy as jnp
from jax.experimental import pallas as pl
from jax.experimental.pallas import tpu as pltpu

LANE = 128     # feature dims padded to multiples of this (lane width)
SUBLANE = 8    # batch padded to multiples of this (sublane width)


def _round_up(x, m):
    return (x + m - 1) // m * m


def _apply_act(y, act):
    if act == "relu":
        return jnp.maximum(y, 0.0)
    if act == "tanh":
        return jnp.tanh(y)
    if act == "silu":
        return y * jax.nn.sigmoid(y)
    raise NotImplementedError(f"activation {act} is not supported")


def _mlp_kernel(x_ref, w_ref, b_ref, o_ref, h_ref, *, act, num_layers):
    """Fused whole-MLP kernel.

    Grid axis 0 = layer index (sequential dependency -> "arbitrary").
    h_ref: VMEM scratch holding the running activation (persists across the
    grid), so activations never touch HBM between layers.
    """
    l = pl.program_id(0)

    # Load the (zero-padded) input into the resident activation buffer.
    @pl.when(l == 0)
    def _():
        h_ref[...] = x_ref[...].astype(jnp.float32)

    # Linear: y = h @ W + b  (MXU, f32 accumulation, lane-dense 128-padded).
    y = jnp.dot(h_ref[...], w_ref[...], preferred_element_type=jnp.float32)
    y = y + b_ref[...]                       # (1, Dpad) broadcast over rows

    # Hidden layers: activation, keep result resident in VMEM.
    @pl.when(l < num_layers - 1)
    def _():
        h_ref[...] = _apply_act(y, act)

    # Final layer: no activation; single lane-dense output store.
    @pl.when(l == num_layers - 1)
    def _():
        o_ref[...] = y.astype(o_ref.dtype)


def mlp_forward(x, params, act_type):
    """x: (batch, in_dim); params: list of (W (K,N), b (N,)). Returns (batch, out_dim)."""
    M, in_dim = x.shape
    L = len(params)
    dims = [in_dim] + [w.shape[1] for (w, _) in params]
    out_dim = dims[-1]

    Dpad = _round_up(max(dims), LANE)
    Mpad = _round_up(max(M, SUBLANE), SUBLANE)

    # Zero-pad input / stack zero-padded weights & biases (exact padding:
    # padded lanes contribute exact zeros and stay zero through activations).
    x_p = jnp.zeros((Mpad, Dpad), jnp.float32).at[:M, :in_dim].set(
        x.astype(jnp.float32))
    w_stack = jnp.zeros((L, Dpad, Dpad), jnp.float32)
    b_stack = jnp.zeros((L, 1, Dpad), jnp.float32)
    for l, (w, b) in enumerate(params):
        K, N = w.shape
        w_stack = w_stack.at[l, :K, :N].set(w.astype(jnp.float32))
        b_stack = b_stack.at[l, 0, :N].set(b.astype(jnp.float32))

    kernel = functools.partial(_mlp_kernel, act=act_type, num_layers=L)

    flops = 2 * Mpad * Dpad * Dpad * L
    transcendentals = Mpad * Dpad * (L - 1) if act_type in ("tanh", "silu") else 0
    bytes_accessed = 4 * (x_p.size + w_stack.size + b_stack.size + Mpad * Dpad)

    out_p = pl.pallas_call(
        kernel,
        out_shape=jax.ShapeDtypeStruct((Mpad, Dpad), jnp.float32),
        grid_spec=pltpu.PrefetchScalarGridSpec(
            num_scalar_prefetch=0,
            grid=(L,),
            in_specs=[
                pl.BlockSpec((Mpad, Dpad), lambda l: (0, 0)),          # x (layer 0 only)
                pl.BlockSpec((None, Dpad, Dpad), lambda l: (l, 0, 0)), # W_l
                pl.BlockSpec((None, 1, Dpad), lambda l: (l, 0, 0)),    # b_l
            ],
            out_specs=pl.BlockSpec((Mpad, Dpad), lambda l: (0, 0)),
            scratch_shapes=[pltpu.VMEM((Mpad, Dpad), jnp.float32)],    # resident activation
        ),
        compiler_params=pltpu.CompilerParams(
            dimension_semantics=("arbitrary",),   # layers are sequential
        ),
        cost_estimate=pl.CostEstimate(
            flops=flops,
            transcendentals=transcendentals,
            bytes_accessed=bytes_accessed,
        ),
    )(x_p, w_stack, b_stack)

    return out_p[:M, :out_dim].astype(x.dtype)


def init_mlp_params(key, in_dim, hid_dim, out_dim, num_hid_layer, dtype=jnp.float32):
    """Glorot-normal weights (std = sqrt(2/(fan_in+fan_out))), zero bias —
    matching MLP.layer_weight_initilizer / layer_bias_initilizer defaults."""
    dims = [in_dim] + [hid_dim] * num_hid_layer + [out_dim]
    params = []
    for i in range(len(dims) - 1):
        fan_in, fan_out = dims[i], dims[i + 1]
        key, wk = jax.random.split(key)
        std = jnp.sqrt(2.0 / (fan_in + fan_out))
        # store as (in, out) so the kernel computes x @ W (== x @ torch_weight.T)
        w = (std * jax.random.normal(wk, (fan_in, fan_out))).astype(dtype)
        b = jnp.zeros((fan_out,), dtype=dtype)
        params.append((w, b))
    return params


def mlp_reference(x, params, act_type):
    """Plain-JAX reference for sanity checking."""
    y = x
    n = len(params)
    for li, (w, b) in enumerate(params):
        y = y @ w + b
        if li < n - 1:
            y = _apply_act(y, act_type)
    return y


if __name__ == "__main__":
    # Small shapes consistent with the module's forward (2-D input: batch x in_dim)
    batch = 8
    in_dim = 16
    hid_dim = 32
    out_dim = 8
    num_hid_layer = 3
    act_type = "tanh"

    key = jax.random.PRNGKey(0)
    key, xk = jax.random.split(key)
    x = jax.random.normal(xk, (batch, in_dim), dtype=jnp.float32)

    params = init_mlp_params(key, in_dim, hid_dim, out_dim, num_hid_layer)

    y = mlp_forward(x, params, act_type)
    y = jax.block_until_ready(y)

    y_ref = mlp_reference(x, params, act_type)
    assert y.shape == (batch, out_dim)
    assert jnp.allclose(y, y_ref, atol=1e-5, rtol=1e-5), "mismatch vs reference"

    print("KERNEL_OK")
</pallas_src>

<mosaic_0001>
module attributes {stable_mosaic.version = 11 : i64} {
  func.func @_mlp_kernel(%arg0: i32, %arg1: memref<8x128xf32, #tpu.memory_space<vmem>>, %arg2: memref<1x128x128xf32, #tpu.memory_space<vmem>>, %arg3: memref<1x1x128xf32, #tpu.memory_space<vmem>>, %arg4: memref<8x128xf32, #tpu.memory_space<vmem>>, %arg5: memref<8x128xf32, #tpu.memory_space<vmem>>) attributes {dimension_semantics = [#tpu.dimension_semantics<arbitrary>], iteration_bounds = array<i64: 4>, scalar_prefetch = 0 : i64, scratch_operands = 1 : i64, tpu.core_type = #tpu.core_type<tc>, window_params = [{pipeline_mode = #tpu.pipeline_mode<synchronous>, transform_indices = @transform_0, window_bounds = array<i64: 8, 128>}, {transform_indices = @transform_1, window_bounds = array<i64: 1, 128, 128>}, {transform_indices = @transform_2, window_bounds = array<i64: 1, 1, 128>}, {pipeline_mode = #tpu.pipeline_mode<synchronous>, transform_indices = @transform_3, window_bounds = array<i64: 8, 128>}]} {
    %c0_i32 = arith.constant 0 : i32
    %0 = arith.cmpi eq, %arg0, %c0_i32 : i32
    %1 = arith.extui %0 : i1 to i32
    %c0_i32_0 = arith.constant 0 : i32
    %2 = arith.cmpi ne, %1, %c0_i32_0 : i32
    scf.if %2 {
      %c0_11 = arith.constant 0 : index
      %c0_12 = arith.constant 0 : index
      %17 = vector.load %arg1[%c0_11, %c0_12] : memref<8x128xf32, #tpu.memory_space<vmem>>, vector<8x128xf32>
      %c0_13 = arith.constant 0 : index
      %c0_14 = arith.constant 0 : index
      %18 = vector.load %arg5[%c0_13, %c0_14] : memref<8x128xf32, #tpu.memory_space<vmem>>, vector<8x128xf32>
      tpu.vector_store %arg5[%c0_13, %c0_14], %17 {strides = array<i32>} : memref<8x128xf32, #tpu.memory_space<vmem>>, vector<8x128xf32>,
    } else {
    }
    %c0 = arith.constant 0 : index
    %c0_1 = arith.constant 0 : index
    %3 = vector.load %arg5[%c0, %c0_1] : memref<8x128xf32, #tpu.memory_space<vmem>>, vector<8x128xf32>
    %c0_2 = arith.constant 0 : index
    %c0_3 = arith.constant 0 : index
    %c0_4 = arith.constant 0 : index
    %4 = vector.load %arg2[%c0_2, %c0_3, %c0_4] : memref<1x128x128xf32, #tpu.memory_space<vmem>>, vector<1x128x128xf32>
    %5 = vector.shape_cast %4 : vector<1x128x128xf32> to vector<128x128xf32>
    %cst = arith.constant dense<0.000000e+00> : vector<8x128xf32>
    %6 = tpu.matmul %3, %5, %cst {dimension_numbers = #tpu.dot_dimension_numbers<[1], [0], [0], [1], [0, 0, 1, 1], [], []>} : vector<8x128xf32>, vector<128x128xf32>, vector<8x128xf32> -> vector<8x128xf32>
    %c0_5 = arith.constant 0 : index
    %c0_6 = arith.constant 0 : index
    %c0_7 = arith.constant 0 : index
    %7 = vector.load %arg3[%c0_5, %c0_6, %c0_7] : memref<1x1x128xf32, #tpu.memory_space<vmem>>, vector<1x1x128xf32>
    %8 = vector.shape_cast %7 : vector<1x1x128xf32> to vector<1x128xf32>
    %9 = vector.broadcast %8 : vector<1x128xf32> to vector<8x128xf32>
    %10 = arith.addf %6, %9 : vector<8x128xf32>
    %c3_i32 = arith.constant 3 : i32
    %11 = arith.cmpi slt, %arg0, %c3_i32 : i32
    %12 = arith.extui %11 : i1 to i32
    %c0_i32_8 = arith.constant 0 : i32
    %13 = arith.cmpi ne, %12, %c0_i32_8 : i32
    scf.if %13 {
      %17 = math.tanh %10 : vector<8x128xf32>
      %c0_11 = arith.constant 0 : index
      %c0_12 = arith.constant 0 : index
      %18 = vector.load %arg5[%c0_11, %c0_12] : memref<8x128xf32, #tpu.memory_space<vmem>>, vector<8x128xf32>
      tpu.vector_store %arg5[%c0_11, %c0_12], %17 {strides = array<i32>} : memref<8x128xf32, #tpu.memory_space<vmem>>, vector<8x128xf32>,
    } else {
    }
    %c3_i32_9 = arith.constant 3 : i32
    %14 = arith.cmpi eq, %arg0, %c3_i32_9 : i32
    %15 = arith.extui %14 : i1 to i32
    %c0_i32_10 = arith.constant 0 : i32
    %16 = arith.cmpi ne, %15, %c0_i32_10 : i32
    scf.if %16 {
      %c0_11 = arith.constant 0 : index
      %c0_12 = arith.constant 0 : index
      %17 = vector.load %arg4[%c0_11, %c0_12] : memref<8x128xf32, #tpu.memory_space<vmem>>, vector<8x128xf32>
      tpu.vector_store %arg4[%c0_11, %c0_12], %10 {strides = array<i32>} : memref<8x128xf32, #tpu.memory_space<vmem>>, vector<8x128xf32>,
    } else {
    }
    return
  }
  func.func @transform_0(%arg0: i32) -> (i32, i32) {
    %c0_i32 = arith.constant 0 : i32
    %c0_i32_0 = arith.constant 0 : i32
    %c0_i32_1 = arith.constant 0 : i32
    return %c0_i32, %c0_i32_0 : i32, i32
  }
  func.func @transform_1(%arg0: i32) -> (i32, i32, i32) {
    %c0_i32 = arith.constant 0 : i32
    %c0_i32_0 = arith.constant 0 : i32
    %c0_i32_1 = arith.constant 0 : i32
    return %arg0, %c0_i32, %c0_i32_0 : i32, i32, i32
  }
  func.func @transform_2(%arg0: i32) -> (i32, i32, i32) {
    %c0_i32 = arith.constant 0 : i32
    %c0_i32_0 = arith.constant 0 : i32
    %c0_i32_1 = arith.constant 0 : i32
    return %arg0, %c0_i32, %c0_i32_0 : i32, i32, i32
  }
  func.func @transform_3(%arg0: i32) -> (i32, i32) {
    %c0_i32 = arith.constant 0 : i32
    %c0_i32_0 = arith.constant 0 : i32
    %c0_i32_1 = arith.constant 0 : i32
    return %c0_i32, %c0_i32_0 : i32, i32
  }
}

</mosaic_0001>

<bundles_post_ra>
// kernel: tpu_custom_call.1
= control target key start
LH: loop header
LB: loop body
LE: loop exit
PB: predicated region body
PF: predicated region fallthrough
CT: control target
= control target key end

     0   :  { %8 = vsyncpa [#allocation4], 0  ;;  %s910_s0 = inlined_call_operand.hbm [shape: f32[8,128], index: 0, kind: input, shape index: {}]   ;;  %s911_s1 = inlined_call_operand.hbm [shape: f32[4,128,128], index: 1, kind: input, shape index: {}]   ;;  %s912_s2 = inlined_call_operand.vmem [shape: f32[4,1,128], index: 2, kind: input, shape index: {}]   ;;  %s913_s3 = inlined_call_operand.hbm [shape: f32[8,128], index: 3, kind: output, shape index: {}]  }
   0x1   :  { %9 = vsyncpa [#allocation7], 0 }
   0x2   :  { %11 = vsyncpa [#allocation7 + $0x1], 0 }
   0x3   :  { %12 = vsyncpa [#allocation5], 0  ;;  %s708_s12 = smov 0   ;;  %s710_s13 = smov 0  }
   0x4   :  { %s712_s14 = smov 0   ;;  %s714_s15 = smov 0  }
   0x5 LB: > { %s727_s16 = sadd.s32 4294967295, %s678_s15   ;;  %s730_s17 = sadd.s32 1, %s678_s15   ;;  %s678_s15 = sphi %s714_s15, %s932_s15   ;;  %s674_s14 = sphi %s712_s14, %s931_s14   ;;  %s670_s13 = sphi %s710_s13, %s930_s13   ;;  %s666_s12 = sphi %s708_s12, %s929_s12  }
   0x6   : > { %s43_s18 = ssub.s32 %s678_s15, %s730_s17  ;;  %s46_s19 = sadd.s32 1, %s674_s14 }
   0x7   : > { %p44_p0 = scmp.eq.s32.totalorder %s43_s18, 0  ;;  %p53_p1 = scmp.ne.s32.totalorder %s674_s14, %s670_s13 }
   0x8   : > { %p54_p2 = scmp.eq.s32.totalorder %s678_s15, 0  ;;  %p59_p3 = scmp.ne.s32.totalorder %s670_s13, %s666_s12 }
   0x9   : > { %s740_s20 = scalar_select %p44_p0, %s674_s14, %s46_s19  }
   0xa   : > { %p742_p4 = por %p54_p2, %p53_p1  ;;  %p914_p5 = scmp.eq.s32.totalorder %s727_s16, 0 }
   0xb   : > { %p394_p6 = scmp.ge.s32.totalorder %s678_s15, 1  ;;  %p117_p7 = scmp.lt.s32.totalorder %s678_s15, 5 }
   0xc   : > { %p751_p8 = por %p914_p5, %p59_p3  ;;  %s680_s24 = smov [#allocation3]  }
   0xd   : > { %p756_p10 = pnand %p394_p6, %p117_p7  ;;  %s130_s25 = sshll.u32 %s680_s24, 4  ;;  %s131_s25 = int_to_ptr.vmem [resolvable:$true] %s130_s25 }
   0xe   : > { %s919_s22 = scalar_select %p751_p8, 1, 0 }
   0xf   : > { %s920_s23 = scalar_select %p756_p10, 1, 0 }
  0x10   : > { %p498_p11 = pneg %p756_p10  ;;  %p507_p12 = scmp.lt.s32.totalorder %s678_s15, 4 }
  0x11   : > { %s141_s26 = sand.u32 1, %s674_s14   ;;  %s552_s5 = scalar_lea.hbm %s910_s0, 128 }
  0x12   : > { %p766_p13 = pnand %p498_p11, %p914_p5  ;;  %p772_p0 = pnand %p507_p12, %p742_p4 }
  0x13   : > { %s397_s29 = sshll.u32 %s141_s26, 7  ;;  %p553_p1 = scmp.ne.s32.totalorder %s910_s0, %s552_s5 }
  0x14   : > { %s922_s28 = scalar_select %p772_p0, 1, 0 }
  0x15   : > { %p554_p2 = pneg %p766_p13  ;;  %p559_p4 = scmp.lt.u32.totalorder %s552_s5, %s910_s0 }
  0x17   : > { %p555_p3 = pnand %p554_p2, %p553_p1 }
  0x19   : > { %p556_p6 = pneg %p555_p3 }
  0x1b   : > { %p561_p7 = pnand %p559_p4, %p556_p6 }
  0x1d   : > { %564 = shalt.err (!%p561_p7)
}
  0x1e   : > { %s565_s10 = scalar_lea.vmem %s131_s25, 128  ;;  %p573_p5 = scmp.lt.s32.totalorder %s131_s25, %s131_s25 }
  0x1f   : > { %p566_p11 = scmp.ne.s32.totalorder %s131_s25, %s565_s10  ;;  %p574_p8 = scmp.lt.s32.totalorder %s565_s10, %s565_s10 }
  0x21   : > { %p568_p12 = pnand %p566_p11, %p554_p2  ;;  %p575_p10 = por %p574_p8, %p573_p5 }
  0x23   : > { %p569_p9 = pneg %p568_p12 }
  0x25   : > { %p576_p0 = pnand %p575_p10, %p569_p9 }
  0x27   : > { %579 = shalt.err (!%p576_p0)
}
  0x28   : > { %501 = dma.hbm_to_vmem [thread:$0]  (!%p766_p13), %s910_s0, 128, %s131_s25, [#allocation4]  }
  0x29   : > { %s411_s18 = sshll.u32 %s678_s15, 11  ;;  %s145_s30 = scalar_lea.vmem [#allocation6], %s397_s29 }
  0x2a   : > { %s796_s24 = scalar_lea.hbm %s911_s1, %s411_s18  ;;  %s152_s4 = sshll.u32 %s145_s30, 4  ;;  %s798_s4 = int_to_ptr.vmem [resolvable:$true] %s152_s4 }
  0x2b   : > { %s800_s27 = scalar_lea.sflag [#allocation7], %s141_s26  ;;  %s580_s5 = scalar_lea.hbm %s796_s24, 2048 }
  0x2c   : > { %p581_p5 = scmp.ne.s32.totalorder %s796_s24, %s580_s5  ;;  %p923_p8 = scmp.ne.s32.totalorder %s922_s28, 0 }
  0x2d   : > { %s585_s6 = scalar_lea.hbm %s911_s1, 8192  ;;  %p586_p0 = scmp.lt.u32.totalorder %s796_s24, %s911_s1 }
  0x2e   : > { %p582_p9 = pneg %p923_p8  ;;  %p587_p1 = scmp.lt.u32.totalorder %s585_s6, %s580_s5 }
  0x2f   : > { %p589_p3 = scmp.lt.u32.totalorder %s580_s5, %s796_s24 }
  0x30   : > { %p583_p10 = pnand %p582_p9, %p581_p5  ;;  %p588_p2 = por %p587_p1, %p586_p0 }
  0x32   : > { %p584_p13 = pneg %p583_p10  ;;  %p590_p6 = por %p589_p3, %p588_p2 }
  0x34   : > { %p591_p4 = pnand %p590_p6, %p584_p13 }
  0x36   : > { %594 = shalt.err (!%p591_p4)
}
  0x37   : > { %s595_s26 = scalar_lea.vmem %s798_s4, 2048  ;;  %s681_s29 = smov [#allocation6]  }
  0x38   : > { %p596_p7 = scmp.ne.s32.totalorder %s798_s4, %s595_s26  ;;  %s600_s9 = sshll.u32 %s681_s29, 4  ;;  %s601_s9 = int_to_ptr.vmem [resolvable:$false] %s600_s9 }
  0x39   : > { %s602_s10 = scalar_lea.vmem %s601_s9, 4096  ;;  %p603_p5 = scmp.lt.s32.totalorder %s798_s4, %s601_s9 }
  0x3a   : > { %p598_p11 = pnand %p596_p7, %p582_p9  ;;  %p604_p10 = scmp.lt.s32.totalorder %s602_s10, %s595_s26 }
  0x3c   : > { %p599_p12 = pneg %p598_p11  ;;  %p605_p0 = por %p604_p10, %p603_p5 }
  0x3e   : > { %p606_p1 = pnand %p605_p0, %p599_p12 }
  0x40   : > { %609 = shalt.err (!%p606_p1)
}
  0x41   : > { %s682_s11 = smov 128   ;;  %s683_s12 = smov 8  }
  0x42   : > { %505 = dma.hbm_to_vmem [thread:$0]  (!%p923_p8), %s796_s24, 2048, %s798_s4, %s800_s27, %s682_s11, %s682_s11, %s683_s12  }
  0x43   : > { %p924_p9 = scmp.ne.s32.totalorder %s920_s23, 0 }
  0x44   : > { %p925_p13 = scmp.eq.s32.totalorder (!%p924_p9), %s727_s16, 0 }
  0x45   : > { %170 = sbr.rel (%p924_p9) target bundleno = 385 (0x181), region = 32 }
  0x4c   : > { %653 = dma.done.wait (%p925_p13), [#allocation4], 128   ;;  %p926_p2 = pmov %p925_p13 }
  0x4d   : > { %s176_s18 = sand.u32 1, %s670_s13   ;;  %p927_p3 = scmp.ne.s32.totalorder %s919_s22, 0 }
  0x4e   : > { %655 = vsyncadd (%p926_p2), [#allocation4], 4294967168  ;;  %s402_s19 = sshll.u32 %s176_s18, 7  ;;  %s177_s21 = scalar_lea.sflag [#allocation7], %s176_s18 }
  0x4f   : > { %s835_s30 = scalar_lea.vmem [#allocation6], %s402_s19 }
  0x50   : > { %657 = dma.done.wait (%p927_p3), %s177_s21, 2048  }
  0x51   : > { %659 = vsyncadd (%p927_p3), %s177_s21, 4294965248  ;;  %p201_p8 = scmp.lt.s32.totalorder %s727_s16, 3  ;;  %p928_p6 = scmp.ne.s32.totalorder %s727_s16, 0 }
  0x52   : > { %v208_v0 = vld [vmem:[#allocation3] sm:$0xff] (!%p928_p6) }
  0x53   : > { %s843_s23 = scalar_select %p201_p8, %s727_s16, 3 }
  0x54   : > { %207 = sbr.rel (%p928_p6) target bundleno = 91 (0x5b), region = 44  ;;  %209 = vst [vmem:[#allocation2] sm:$0xff] (!%p928_p6), %v208_v0 }
  0x55   : > { %s203_s4 = scalar_lea.vmem %s912_s2, %s843_s23 }
  0x5b PF: > { %v211_v1 = vld [vmem:[%s835_s30] sm:$0xff]  ;;  %v212_v2 = vld [vmem:[%s835_s30 + $0x8] sm:$0xff]  ;;  %v213_v3 = vld [vmem:[%s835_s30 + $0x10] sm:$0xff]  ;;  %v684_v4 = vmov 0.0|0.0   ;;  %vm685_vm0 = vmmov 0   ;;  %v686_v7 = vmov 0.0  }
  0x5c   : > { %464 = vmatprep.subr.bf16.mxu0 %v684_v4  ;;  %v465_v5 = vpack.c.bf16 %v212_v2, %v211_v1  ;;  %v214_v6 = vld [vmem:[%s835_s30 + $0x18] sm:$0xff]  ;;  %461 = vmatprep.mubr.msk.f32.mxu0 %vm685_vm0, %v686_v7  ;;  %v215_v9 = vld [vmem:[%s835_s30 + $0x20] sm:$0xff]  ;;  %v216_v10 = vld [vmem:[%s835_s30 + $0x28] sm:$0xff]  ;;  %p405_p4 = scmp.ge.s32.totalorder %s727_s16, 3 }
  0x5d   : > { %v468_v8 = vpack.c.bf16 %v214_v6, %v213_v3  ;;  %v471_v11 = vpack.c.bf16 %v216_v10, %v215_v9  ;;  %v217_v12 = vld [vmem:[%s835_s30 + $0x30] sm:$0xff]  ;;  %v218_v13 = vld [vmem:[%s835_s30 + $0x38] sm:$0xff]  ;;  %v219_v15 = vld [vmem:[%s835_s30 + $0x40] sm:$0xff] }
  0x5e   : > { %466 = vmatpush3.bf16.msra.mxu0 %v465_v5  ;;  %v474_v14 = vpack.c.bf16 %v218_v13, %v217_v12  ;;  %v220_v16 = vld [vmem:[%s835_s30 + $0x48] sm:$0xff]  ;;  %v221_v18 = vld [vmem:[%s835_s30 + $0x50] sm:$0xff]  ;;  %v222_v19 = vld [vmem:[%s835_s30 + $0x58] sm:$0xff] }
  0x5f   : > { %467 = vmatprep.subr.bf16.mxu0 %v684_v4  ;;  %v477_v17 = vpack.c.bf16 %v220_v16, %v219_v15  ;;  %v480_v20 = vpack.c.bf16 %v222_v19, %v221_v18  ;;  %v223_v21 = vld [vmem:[%s835_s30 + $0x60] sm:$0xff]  ;;  %v224_v22 = vld [vmem:[%s835_s30 + $0x68] sm:$0xff]  ;;  %v225_v24 = vld [vmem:[%s835_s30 + $0x70] sm:$0xff] }
  0x60   : > { %v483_v23 = vpack.c.bf16 %v224_v22, %v223_v21  ;;  %v226_v25 = vld [vmem:[%s835_s30 + $0x78] sm:$0xff]  ;;  %v210_v27 = vld [vmem:[#allocation2] sm:$0xff] }
  0x61   : > { %v486_v26 = vpack.c.bf16 %v226_v25, %v225_v24  ;;  %v404_v28 = vld [vmem:[%s203_s4] ss:$0 sm:$0xff] }
  0x62   : > { %469 = vmatpush3.bf16.msra.mxu0 %v468_v8 }
  0x63   : > { %470 = vmatprep.subr.bf16.mxu0 %v684_v4 }
  0x66   : > { %472 = vmatpush3.bf16.msra.mxu0 %v471_v11 }
  0x67   : > { %473 = vmatprep.subr.bf16.mxu0 %v684_v4 }
  0x6a   : > { %475 = vmatpush3.bf16.msra.mxu0 %v474_v14 }
  0x6b   : > { %476 = vmatprep.subr.bf16.mxu0 %v684_v4 }
  0x6e   : > { %478 = vmatpush3.bf16.msra.mxu0 %v477_v17 }
  0x6f   : > { %479 = vmatprep.subr.bf16.mxu0 %v684_v4 }
  0x72   : > { %481 = vmatpush3.bf16.msra.mxu0 %v480_v20 }
  0x73   : > { %482 = vmatprep.subr.bf16.mxu0 %v684_v4 }
  0x76   : > { %484 = vmatpush3.bf16.msra.mxu0 %v483_v23 }
  0x77   : > { %485 = vmatprep.subr.bf16.mxu0 %v684_v4 }
  0x7a   : > { %487 = vmatpush3.bf16.msra.mxu0 %v486_v26 }
  0x7d   : > { %462 = vmatmul.mubr.f32.vlgmr.msra.gmra.mrb[0].mxu0 %v210_v27 }
 0x14b   : > { %307 = sbr.rel (%p405_p4) target bundleno = 351 (0x15f), region = 48 }
 0x150   : > { %v300_v29 = vpop.f32.mrb[0].mxu0 }
 0x151   : > { %v301_v30 = vadd.f32 %v404_v28, %v300_v29  ;;  %v463_v31 = vpop.f32.mrb[1].mxu0 }
 0x153   : > { %550 = vtanh.f32 %v301_v30 }
 0x15d   : > { %v551_v32 = vpop.eup %550 }
 0x15e   : > { %309 = vst [vmem:[#allocation2] sm:$0xff] %v551_v32 }
 0x15f PF: > { %p406_p7 = scmp.ne.s32.totalorder %s727_s16, 3 }
 0x160   : > { %314 = vst [vmem:[#allocation8] sm:$0xff] (!%p406_p7), %v301_v30 }
 0x161   : > { %313 = sbr.rel (%p406_p7) target bundleno = 360 (0x168), region = 52 }
 0x168 PF: > { %p509_p11 = scmp.eq.s32.totalorder %s727_s16, 3  ;;  %s687_s5 = smov [#allocation8]  }
 0x169   : > { %s322_s15 = sshll.u32 %s687_s5, 4  ;;  %s323_s15 = int_to_ptr.vmem [resolvable:$true] %s322_s15 }
 0x16a   : > { %s610_s25 = scalar_lea.vmem %s323_s15, 128  ;;  %p617_p0 = scmp.lt.s32.totalorder %s323_s15, %s323_s15 }
 0x16b   : > { %p611_p12 = scmp.ne.s32.totalorder %s323_s15, %s610_s25  ;;  %p618_p1 = scmp.lt.s32.totalorder %s610_s25, %s610_s25 }
 0x16d   : > { %p612_p5 = pnand %p611_p12, %p509_p11  ;;  %p619_p9 = por %p618_p1, %p617_p0 }
 0x16f   : > { %p613_p10 = pneg %p612_p5 }
 0x171   : > { %p620_p13 = pnand %p619_p9, %p613_p10 }
 0x173   : > { %623 = shalt.err (!%p620_p13)
}
 0x174   : > { %s624_s8 = scalar_lea.hbm %s913_s3, 128 }
 0x175   : > { %p625_p2 = scmp.ne.s32.totalorder %s913_s3, %s624_s8  ;;  %p630_p6 = scmp.lt.u32.totalorder %s624_s8, %s913_s3 }
 0x177   : > { %p626_p3 = pnand %p625_p2, %p509_p11 }
 0x179   : > { %p627_p8 = pneg %p626_p3 }
 0x17b   : > { %p632_p4 = pnand %p630_p6, %p627_p8 }
 0x17d   : > { %635 = shalt.err (!%p632_p4)
}
 0x17e   : > { %495 = dma.vmem_to_hbm [thread:$0]  (%p509_p11), %s323_s15, 128, %s913_s3, [#allocation5]  }
 0x17f   : > { %661 = dma.done.wait (%p509_p11), [#allocation5], 128  }
 0x180   : > { %663 = vsyncadd (%p509_p11), [#allocation5], 4294967168 }
 0x181 PF: > { %p15_p7 = scmp.ge.s32.totalorder %s730_s17, 6   ;;  %s929_s12 = smov %s670_s13 }
 0x182   : > { %s930_s13 = smov %s674_s14  ;;  %s931_s14 = smov %s740_s20 }
 0x183   : > { %s932_s15 = smov %s730_s17  ;;  %17 = sbr.rel (!%p15_p7) target bundleno = 5 (0x5), region = 89 }
 0x18a   :  { %335 = vsyncpa [#allocation4], 1 }
 0x18b   :  { %337 = vsyncpa [#allocation4 + $0x1], 1 }
 0x18c   :  { %338 = vsyncpa [#allocation7], 1 }
 0x18d   :  { %340 = vsyncpa [#allocation7 + $0x1], 1 }
 0x18e   :  { %341 = vsyncpa [#allocation5], 1 }
 0x18f   :  { %343 = vsyncpa [#allocation5 + $0x1], 1 }

</bundles_post_ra>
